<compile_context>
chip_gen: v6e
topology: v6e:2x2x1
jax: 0.10.0
libtpu: 0.0.40
codegen_flags: <defaults>
</compile_context>

<pallas_src>
import jax
import jax.numpy as jnp
from jax.experimental import pallas as pl
from jax.experimental.pallas import tpu as pltpu


def _round_up(v, m):
    return -(-v // m) * m


def mlp_kernel(x_ref, w1_ref, b1_ref, w2_ref, b2_ref, w3_ref, b3_ref,
               inter_ref, out_ref):
    # x_ref: (TB, D) f32 -> cast to bf16 in-register (cheap VPU op, hides under MXU).
    x = x_ref[...].astype(jnp.bfloat16)

    # layers1[0]: Linear(D, 256) + ReLU  (bf16 operands, f32 accumulation)
    h = jnp.dot(x, w1_ref[...], preferred_element_type=jnp.float32) + b1_ref[...]
    h = jnp.maximum(h, 0.0)

    # layers1[2]: Linear(256, 2*O) + Sigmoid -> "intermediate"
    z = jnp.dot(h.astype(jnp.bfloat16), w2_ref[...],
                preferred_element_type=jnp.float32) + b2_ref[...]
    inter = jax.nn.sigmoid(z)

    # layers2: Linear(2*O, O)
    o = jnp.dot(inter.astype(jnp.bfloat16), w3_ref[...],
                preferred_element_type=jnp.float32) + b3_ref[...]

    # Two separate lane-sparse stores; no concat, no wrapper slicing.
    # NOTE: rows of a partial last block hold unspecified data — all ops here are
    # per-row, and the writeback is clipped; do not add cross-row reductions.
    inter_ref[...] = inter.astype(inter_ref.dtype)
    out_ref[...] = o.astype(out_ref.dtype)


def linear_model_forward(in_val, _1, _2, params):
    """Mirrors LinearModel.forward. Returns (out_val, {'orig': intermediate, ...})."""
    B = in_val.shape[0]
    x = in_val.reshape(B, -1)                       # contiguous().view(B, -1)
    if x.dtype != jnp.float32:
        x = x.astype(jnp.float32)
    w1, b1, w2, b2, w3, b3 = params

    D = x.shape[1]
    H = w1.shape[1]
    M = w2.shape[1]          # output_size * 2
    O = w3.shape[1]          # output_size

    # Weights pre-cast to bf16 at init -> these astype calls are no-ops in the hot path.
    w1b = w1.astype(jnp.bfloat16)
    w2b = w2.astype(jnp.bfloat16)
    w3b = w3.astype(jnp.bfloat16)
    b1f = b1.astype(jnp.float32)
    b2f = b2.astype(jnp.float32)
    b3f = b3.astype(jnp.float32)

    # Batch tile: big (amortize ~0.35us/step overhead), balanced (>=2 even steps
    # for v7x's 2 TCs when B is large), second-to-last block dim a multiple of 8
    # (or equal to the full batch dim for tiny B).
    if B <= 8:
        TB = B
    else:
        TB = min(2048, _round_up(pl.cdiv(B, 2), 16))
        TB = min(TB, _round_up(B, 8))
    grid = (pl.cdiv(B, TB),)      # partial last block is clipped on writeback

    inter, out = pl.pallas_call(
        mlp_kernel,
        out_shape=(jax.ShapeDtypeStruct((B, M), jnp.float32),
                   jax.ShapeDtypeStruct((B, O), jnp.float32)),
        grid=grid,
        in_specs=[
            pl.BlockSpec((TB, D), lambda i: (i, 0)),   # x: tiled over batch (f32)
            pl.BlockSpec((D, H), lambda i: (0, 0)),    # weights/biases VMEM-resident
            pl.BlockSpec((1, H), lambda i: (0, 0)),
            pl.BlockSpec((H, M), lambda i: (0, 0)),
            pl.BlockSpec((1, M), lambda i: (0, 0)),
            pl.BlockSpec((M, O), lambda i: (0, 0)),
            pl.BlockSpec((1, O), lambda i: (0, 0)),
        ],
        out_specs=(pl.BlockSpec((TB, M), lambda i: (i, 0)),
                   pl.BlockSpec((TB, O), lambda i: (i, 0))),
        compiler_params=pltpu.CompilerParams(
            dimension_semantics=("parallel",)),        # shard batch across TCs (v7x)
        cost_estimate=pl.CostEstimate(
            flops=2 * B * (D * H + H * M + M * O),
            transcendentals=2 * B * M,                  # sigmoid ~ exp + reciprocal
            bytes_accessed=(B * D * 4                   # x (f32, cast in-kernel)
                            + (D * H + H * M + M * O) * 2   # weights (bf16)
                            + (H + M + O) * 4               # biases (f32)
                            + B * (M + O) * 4)),            # two f32 outputs
    )(x, w1b, b1f, w2b, b2f, w3b, b3f)

    # NOTE: the 'neg:' key (with colon) is copied verbatim from the PyTorch module.
    return out, {'orig': inter, 'pos': None, 'neg:': None}


def init_params(key, input_length, input_channels, output_size,
                intermediate_size=256):
    """PyTorch-nn.Linear-style uniform(+-1/sqrt(fan_in)) init.

    Weights stored (in, out) and pre-cast to bf16 (MXU operand dtype) so the
    forward path does no per-call weight casting; biases stay f32.
    """
    d_in = input_length * input_channels
    d_mid = output_size * 2
    k1, k2, k3, k4, k5, k6 = jax.random.split(key, 6)

    def lin(kw, kb, fan_in, fan_out):
        bound = 1.0 / jnp.sqrt(fan_in)
        w = jax.random.uniform(kw, (fan_in, fan_out), jnp.float32, -bound, bound)
        b = jax.random.uniform(kb, (1, fan_out), jnp.float32, -bound, bound)
        return w.astype(jnp.bfloat16), b

    w1, b1 = lin(k1, k2, d_in, intermediate_size)
    w2, b2 = lin(k3, k4, intermediate_size, d_mid)
    w3, b3 = lin(k5, k6, d_mid, output_size)
    return (w1, b1, w2, b2, w3, b3)


def _reference_forward(in_val, params):
    """Pure-JAX f32 reference (bf16->f32 weight cast is exact)."""
    w1, b1, w2, b2, w3, b3 = params
    x = in_val.reshape(in_val.shape[0], -1).astype(jnp.float32)
    h = jnp.maximum(x @ w1.astype(jnp.float32) + b1.astype(jnp.float32), 0.0)
    inter = jax.nn.sigmoid(h @ w2.astype(jnp.float32) + b2.astype(jnp.float32))
    out = inter @ w3.astype(jnp.float32) + b3.astype(jnp.float32)
    return out, inter


if __name__ == "__main__":
    # Small shapes consistent with the module's forward:
    # batch=2, channels=4, length=16 -> flattened feature dim 64; output_size=8.
    batch, input_channels, input_length, output_size = 2, 4, 16, 8

    key = jax.random.PRNGKey(0)
    k_x, k_p = jax.random.split(key)
    in_val = jax.random.normal(k_x, (batch, input_channels, input_length), jnp.float32)
    params = init_params(k_p, input_length, input_channels, output_size)

    out_val, aux = linear_model_forward(in_val, None, None, params)
    jax.block_until_ready(out_val)
    jax.block_until_ready(aux['orig'])

    assert out_val.shape == (batch, output_size)
    assert aux['orig'].shape == (batch, output_size * 2)

    # Numerical sanity check vs. f32 reference (loose tolerance: bf16 activations).
    ref_out, ref_inter = _reference_forward(in_val, params)
    assert jnp.allclose(out_val, ref_out, atol=1e-1, rtol=1e-1)
    assert jnp.allclose(aux['orig'], ref_inter, atol=1e-1, rtol=1e-1)

    print("KERNEL_OK")
</pallas_src>

<mosaic_0001>
module attributes {stable_mosaic.version = 11 : i64} {
  func.func @mlp_kernel(%arg0: i32, %arg1: memref<2x64xf32, #tpu.memory_space<vmem>>, %arg2: memref<64x256xbf16, #tpu.memory_space<vmem>>, %arg3: memref<1x256xf32, #tpu.memory_space<vmem>>, %arg4: memref<256x16xbf16, #tpu.memory_space<vmem>>, %arg5: memref<1x16xf32, #tpu.memory_space<vmem>>, %arg6: memref<16x8xbf16, #tpu.memory_space<vmem>>, %arg7: memref<1x8xf32, #tpu.memory_space<vmem>>, %arg8: memref<2x16xf32, #tpu.memory_space<vmem>>, %arg9: memref<2x8xf32, #tpu.memory_space<vmem>>) attributes {dimension_semantics = [#tpu.dimension_semantics<parallel>], iteration_bounds = array<i64: 1>, scalar_prefetch = 0 : i64, scratch_operands = 0 : i64, tpu.core_type = #tpu.core_type<tc>, window_params = [{transform_indices = @transform_0, window_bounds = array<i64: 2, 64>}, {pipeline_mode = #tpu.pipeline_mode<synchronous>, transform_indices = @transform_1, window_bounds = array<i64: 64, 256>}, {pipeline_mode = #tpu.pipeline_mode<synchronous>, transform_indices = @transform_2, window_bounds = array<i64: 1, 256>}, {pipeline_mode = #tpu.pipeline_mode<synchronous>, transform_indices = @transform_3, window_bounds = array<i64: 256, 16>}, {pipeline_mode = #tpu.pipeline_mode<synchronous>, transform_indices = @transform_4, window_bounds = array<i64: 1, 16>}, {pipeline_mode = #tpu.pipeline_mode<synchronous>, transform_indices = @transform_5, window_bounds = array<i64: 16, 8>}, {pipeline_mode = #tpu.pipeline_mode<synchronous>, transform_indices = @transform_6, window_bounds = array<i64: 1, 8>}, {transform_indices = @transform_7, window_bounds = array<i64: 2, 16>}, {transform_indices = @transform_8, window_bounds = array<i64: 2, 8>}]} {
    %c0 = arith.constant 0 : index
    %c0_0 = arith.constant 0 : index
    %0 = vector.load %arg1[%c0, %c0_0] : memref<2x64xf32, #tpu.memory_space<vmem>>, vector<2x64xf32>
    %1 = arith.truncf %0 : vector<2x64xf32> to vector<2x64xbf16>
    %c0_1 = arith.constant 0 : index
    %c0_2 = arith.constant 0 : index
    %2 = vector.load %arg2[%c0_1, %c0_2] : memref<64x256xbf16, #tpu.memory_space<vmem>>, vector<64x256xbf16>
    %cst = arith.constant dense<0.000000e+00> : vector<2x256xf32>
    %3 = tpu.matmul %1, %2, %cst {dimension_numbers = #tpu.dot_dimension_numbers<[1], [0], [0], [1], [0, 0, 1, 1], [], []>} : vector<2x64xbf16>, vector<64x256xbf16>, vector<2x256xf32> -> vector<2x256xf32>
    %c0_3 = arith.constant 0 : index
    %c0_4 = arith.constant 0 : index
    %4 = vector.load %arg3[%c0_3, %c0_4] : memref<1x256xf32, #tpu.memory_space<vmem>>, vector<1x256xf32>
    %5 = vector.broadcast %4 : vector<1x256xf32> to vector<2x256xf32>
    %6 = arith.addf %3, %5 : vector<2x256xf32>
    %cst_5 = arith.constant 0.000000e+00 : f32
    %7 = vector.broadcast %cst_5 : f32 to vector<2x256xf32>
    %8 = arith.maximumf %6, %7 : vector<2x256xf32>
    %9 = arith.truncf %8 : vector<2x256xf32> to vector<2x256xbf16>
    %c0_6 = arith.constant 0 : index
    %c0_7 = arith.constant 0 : index
    %10 = vector.load %arg4[%c0_6, %c0_7] : memref<256x16xbf16, #tpu.memory_space<vmem>>, vector<256x16xbf16>
    %cst_8 = arith.constant dense<0.000000e+00> : vector<2x16xf32>
    %11 = tpu.matmul %9, %10, %cst_8 {dimension_numbers = #tpu.dot_dimension_numbers<[1], [0], [0], [1], [0, 0, 1, 1], [], []>} : vector<2x256xbf16>, vector<256x16xbf16>, vector<2x16xf32> -> vector<2x16xf32>
    %c0_9 = arith.constant 0 : index
    %c0_10 = arith.constant 0 : index
    %12 = vector.load %arg5[%c0_9, %c0_10] : memref<1x16xf32, #tpu.memory_space<vmem>>, vector<1x16xf32>
    %13 = vector.broadcast %12 : vector<1x16xf32> to vector<2x16xf32>
    %14 = arith.addf %11, %13 : vector<2x16xf32>
    %15 = arith.negf %14 : vector<2x16xf32>
    %16 = math.exp %15 : vector<2x16xf32>
    %cst_11 = arith.constant 1.000000e+00 : f32
    %17 = vector.broadcast %cst_11 : f32 to vector<2x16xf32>
    %18 = arith.addf %17, %16 : vector<2x16xf32>
    %19 = arith.divf %17, %18 : vector<2x16xf32>
    %20 = arith.truncf %19 : vector<2x16xf32> to vector<2x16xbf16>
    %c0_12 = arith.constant 0 : index
    %c0_13 = arith.constant 0 : index
    %21 = vector.load %arg6[%c0_12, %c0_13] : memref<16x8xbf16, #tpu.memory_space<vmem>>, vector<16x8xbf16>
    %cst_14 = arith.constant dense<0.000000e+00> : vector<2x8xf32>
    %22 = tpu.matmul %20, %21, %cst_14 {dimension_numbers = #tpu.dot_dimension_numbers<[1], [0], [0], [1], [0, 0, 1, 1], [], []>} : vector<2x16xbf16>, vector<16x8xbf16>, vector<2x8xf32> -> vector<2x8xf32>
    %c0_15 = arith.constant 0 : index
    %c0_16 = arith.constant 0 : index
    %23 = vector.load %arg7[%c0_15, %c0_16] : memref<1x8xf32, #tpu.memory_space<vmem>>, vector<1x8xf32>
    %24 = vector.broadcast %23 : vector<1x8xf32> to vector<2x8xf32>
    %25 = arith.addf %22, %24 : vector<2x8xf32>
    %c0_17 = arith.constant 0 : index
    %c0_18 = arith.constant 0 : index
    %26 = vector.load %arg8[%c0_17, %c0_18] : memref<2x16xf32, #tpu.memory_space<vmem>>, vector<2x16xf32>
    tpu.vector_store %arg8[%c0_17, %c0_18], %19 {strides = array<i32>} : memref<2x16xf32, #tpu.memory_space<vmem>>, vector<2x16xf32>,
    %c0_19 = arith.constant 0 : index
    %c0_20 = arith.constant 0 : index
    %27 = vector.load %arg9[%c0_19, %c0_20] : memref<2x8xf32, #tpu.memory_space<vmem>>, vector<2x8xf32>
    tpu.vector_store %arg9[%c0_19, %c0_20], %25 {strides = array<i32>} : memref<2x8xf32, #tpu.memory_space<vmem>>, vector<2x8xf32>,
    return
  }
  func.func @transform_0(%arg0: i32) -> (i32, i32) {
    %c0_i32 = arith.constant 0 : i32
    %c0_i32_0 = arith.constant 0 : i32
    return %arg0, %c0_i32 : i32, i32
  }
  func.func @transform_1(%arg0: i32) -> (i32, i32) {
    %c0_i32 = arith.constant 0 : i32
    %c0_i32_0 = arith.constant 0 : i32
    %c0_i32_1 = arith.constant 0 : i32
    return %c0_i32, %c0_i32_0 : i32, i32
  }
  func.func @transform_2(%arg0: i32) -> (i32, i32) {
    %c0_i32 = arith.constant 0 : i32
    %c0_i32_0 = arith.constant 0 : i32
    %c0_i32_1 = arith.constant 0 : i32
    return %c0_i32, %c0_i32_0 : i32, i32
  }
  func.func @transform_3(%arg0: i32) -> (i32, i32) {
    %c0_i32 = arith.constant 0 : i32
    %c0_i32_0 = arith.constant 0 : i32
    %c0_i32_1 = arith.constant 0 : i32
    return %c0_i32, %c0_i32_0 : i32, i32
  }
  func.func @transform_4(%arg0: i32) -> (i32, i32) {
    %c0_i32 = arith.constant 0 : i32
    %c0_i32_0 = arith.constant 0 : i32
    %c0_i32_1 = arith.constant 0 : i32
    return %c0_i32, %c0_i32_0 : i32, i32
  }
  func.func @transform_5(%arg0: i32) -> (i32, i32) {
    %c0_i32 = arith.constant 0 : i32
    %c0_i32_0 = arith.constant 0 : i32
    %c0_i32_1 = arith.constant 0 : i32
    return %c0_i32, %c0_i32_0 : i32, i32
  }
  func.func @transform_6(%arg0: i32) -> (i32, i32) {
    %c0_i32 = arith.constant 0 : i32
    %c0_i32_0 = arith.constant 0 : i32
    %c0_i32_1 = arith.constant 0 : i32
    return %c0_i32, %c0_i32_0 : i32, i32
  }
  func.func @transform_7(%arg0: i32) -> (i32, i32) {
    %c0_i32 = arith.constant 0 : i32
    %c0_i32_0 = arith.constant 0 : i32
    return %arg0, %c0_i32 : i32, i32
  }
  func.func @transform_8(%arg0: i32) -> (i32, i32) {
    %c0_i32 = arith.constant 0 : i32
    %c0_i32_0 = arith.constant 0 : i32
    return %arg0, %c0_i32 : i32, i32
  }
}

</mosaic_0001>

<bundles_post_ra>
// kernel: tpu_custom_call.1
= control target key start
LH: loop header
LB: loop body
LE: loop exit
PB: predicated region body
PF: predicated region fallthrough
CT: control target
= control target key end

     0   :  { %14 = vsyncpa [#allocation3], 0  ;;  %v557_v2 = vmov 0   ;;  %vm93_vm0 = vcmask 523264   ;;  %s700_s0 = inlined_call_operand.vmem [shape: f32[2,64], index: 0, kind: input, shape index: {}]   ;;  %s701_s1 = inlined_call_operand.vmem [shape: bf16[64,256], index: 1, kind: input, shape index: {}]   ;;  %s702_s2 = inlined_call_operand.vmem [shape: f32[1,256], index: 2, kind: input, shape index: {}]   ;;  %s703_s3 = inlined_call_operand.vmem [shape: bf16[256,16], index: 3, kind: input, shape index: {}]   ;;  %s704_s4 = inlined_call_operand.vmem [shape: f32[1,16], index: 4, kind: input, shape index: {}]   ;;  %s705_s5 = inlined_call_operand.vmem [shape: bf16[16,8], index: 5, kind: input, shape index: {}]   ;;  %s706_s6 = inlined_call_operand.vmem [shape: f32[1,8], index: 6, kind: input, shape index: {}]   ;;  %s707_s7 = inlined_call_operand.hbm [shape: f32[2,16], index: 7, kind: output, shape index: {0}]   ;;  %s708_s8 = inlined_call_operand.hbm [shape: f32[2,8], index: 8, kind: output, shape index: {1}]  }
   0x1   :  { %v480_v0 = vld [vmem:[%s701_s1 + $0x34] ss:$8 sps:$4 sm:$0xff]   ;;  %v482_v1 = vld [vmem:[%s701_s1 + $0x30] ss:$8 sps:$4 sm:$0xff]   ;;  %129 = vmatprep.mubr.bf16.mxu0 %v557_v2  ;;  %v483_v3 = vld [vmem:[%s701_s1 + $0x24] ss:$8 sps:$4 sm:$0xff]  }
   0x2   :  { %105 = vmatprep.subr.bf16.mxu0 %v480_v0  ;;  %v485_v4 = vld [vmem:[%s701_s1 + $0x20] ss:$8 sps:$4 sm:$0xff]   ;;  %v486_v5 = vld [vmem:[%s701_s1 + $0x14] ss:$8 sps:$4 sm:$0xff]   ;;  %v488_v6 = vld [vmem:[%s701_s1 + $0x10] ss:$8 sps:$4 sm:$0xff]  }
   0x3   :  { %106 = vmatpush1.bf16.msra.mxu0 %v482_v1  ;;  %v489_v7 = vld [vmem:[%s701_s1 + $0x4] ss:$8 sps:$4 sm:$0xff]   ;;  %v492_v8 = vld [vmem:[%s703_s3 + $0x78] sm:$0xff]   ;;  %v494_v10 = vld [vmem:[%s703_s3 + $0x70] sm:$0xff]  }
   0x4   :  { %107 = vmatprep.subr.bf16.mxu0 %v483_v3  ;;  %v493_v9 = vld [vmem:[%s703_s3 + $0x38] sm:$0xff]   ;;  %445 = vmatprep.subr.bf16.mxu1 %v492_v8  ;;  %v491_v11 = vld [vmem:[%s701_s1] ss:$8 sps:$4 sm:$0xff]   ;;  %v495_v12 = vld [vmem:[%s703_s3 + $0x30] sm:$0xff]  }
   0x5   :  { %446 = vmatpush3.bf16.msra.mxu1 %v493_v9  ;;  %v496_v13 = vld [vmem:[%s703_s3 + $0x68] sm:$0xff]   ;;  %v31_v14 = vld [vmem:[%s700_s0] sm:$0x3]  ;;  %v500_v19 = vld [vmem:[%s703_s3 + $0x58] sm:$0xff]  }
   0x6   :  { %447 = vmatprep.subr.bf16.mxu1 %v494_v10  ;;  %v497_v15 = vld [vmem:[%s703_s3 + $0x28] sm:$0xff]   ;;  %v32_v16 = vpack.c.bf16 %v31_v14, %v31_v14  ;;  %v498_v17 = vld [vmem:[%s703_s3 + $0x60] sm:$0xff]   ;;  %v501_v20 = vld [vmem:[%s703_s3 + $0x18] sm:$0xff]  }
   0x7   :  { %108 = vmatpush1.bf16.msra.mxu0 %v485_v4  ;;  %v499_v18 = vld [vmem:[%s703_s3 + $0x20] sm:$0xff]  }
   0x8   :  { %109 = vmatprep.subr.bf16.mxu0 %v486_v5 }
   0x9   :  { %448 = vmatpush3.bf16.msra.mxu1 %v495_v12 }
   0xa   :  { %449 = vmatprep.subr.bf16.mxu1 %v496_v13 }
   0xb   :  { %110 = vmatpush1.bf16.msra.mxu0 %v488_v6 }
   0xc   :  { %111 = vmatprep.subr.bf16.mxu0 %v489_v7 }
   0xd   :  { %450 = vmatpush3.bf16.msra.mxu1 %v497_v15 }
   0xe   :  { %451 = vmatprep.subr.bf16.mxu1 %v498_v17 }
   0xf   :  { %112 = vmatpush1.bf16.msra.mxu0 %v491_v11 }
  0x11   :  { %452 = vmatpush3.bf16.msra.mxu1 %v499_v18 }
  0x12   :  { %423 = vmatmul.mubr.msk.bf16.vlgmr.msra.gmra.mxu0 %vm93_vm0, %v32_v16 }
  0x13   :  { %15 = vsyncpa [#allocation5], 0  ;;  %453 = vmatprep.subr.bf16.mxu1 %v500_v19  ;;  %v502_v21 = vld [vmem:[%s703_s3 + $0x50] sm:$0xff]   ;;  %v504_v23 = vld [vmem:[%s703_s3 + $0x48] sm:$0xff]   ;;  %v43_v27 = vlaneseq  ;;  %v558_v45 = vmov 0.0   ;;  %vm559_vm1 = vmmov 0  }
  0x14   :  { %v503_v22 = vld [vmem:[%s703_s3 + $0x10] sm:$0xff]   ;;  %v505_v24 = vld [vmem:[%s703_s3 + $0x8] sm:$0xff]   ;;  %v506_v25 = vld [vmem:[%s703_s3 + $0x40] sm:$0xff]   ;;  %469 = vmatprep.subr.bf16.mxu0 %v558_v45  ;;  %471 = vmatprep.mubr.msk.bf16.mxu0 %vm559_vm1, %v558_v45  ;;  %vm383_vm2 = vcmask 123904   ;;  %vm339_vm3 = vcmask 130048  }
  0x15   :  { %454 = vmatpush3.bf16.msra.mxu1 %v501_v20  ;;  %v507_v26 = vld [vmem:[%s703_s3] sm:$0xff]   ;;  %v44_v28 = vshrl.u32 %v43_v27, 7 }
  0x16   :  { %455 = vmatprep.subr.bf16.mxu1 %v502_v21  ;;  %v41_v30 = vld [vmem:[%s702_s2] sm:$0x3] }
  0x17   :  { %v45_v29 = vsub.s32 0, %v44_v28  ;;  %v49_v31 = vsub.s32 1, %v44_v28  ;;  %v508_v44 = vld [vmem:[%s705_s5] sm:$0xff]   ;;  %s560_s5 = smov [#allocation2]  }
  0x18   :  { %470 = vmatpush3.bf16.msra.mxu0 %v508_v44  ;;  %v424_v47 = vld [vmem:[%s704_s4] ss:$0 sm:$0xff]  ;;  %s393_s1 = sshll.u32 %s560_s5, 4  ;;  %s394_s1 = int_to_ptr.vmem [resolvable:$true] %s393_s1 }
  0x19   :  { %456 = vmatpush3.bf16.msra.mxu1 %v503_v22  ;;  %v46_v32 = vrot.slane %v41_v30, %v45_v29  ;;  %v50_v33 = vrot.slane %v41_v30, %v49_v31  ;;  %s513_s4 = scalar_lea.vmem %s394_s1, 32  ;;  %p518_p1 = scmp.lt.s32.totalorder %s394_s1, %s394_s1 }
  0x1a   :  { %457 = vmatprep.subr.bf16.mxu1 %v504_v23  ;;  %p514_p0 = scmp.ne.s32.totalorder %s394_s1, %s513_s4  ;;  %p519_p2 = scmp.lt.s32.totalorder %s513_s4, %s513_s4 }
  0x1c   :  { %p520_p3 = por %p519_p2, %p518_p1 }
  0x1d   :  { %458 = vmatpush3.bf16.msra.mxu1 %v505_v24 }
  0x1e   :  { %459 = vmatprep.subr.bf16.mxu1 %v506_v25  ;;  %p521_p4 = pnand %p520_p3, %p514_p0 }
  0x21   :  { %460 = vmatpush3.bf16.msra.mxu1 %v507_v26 }
  0xd2   :  { %v131_v34 = vpop.f32.mrf.mxu0 }
  0xd3   :  { %v132_v35 = vadd.f32 %v131_v34, %v46_v32 }
  0xd4   :  { %v133_v36 = vpop.f32.mrf.mxu0 }
  0xd5   :  { %v134_v37 = vadd.f32 %v133_v36, %v50_v33  ;;  %v138_v38 = vmax.f32 %v132_v35, 0.0 }
  0xd6   :  { %v135_v39 = vpop.f32.mrf.mxu0 }
  0xd7   :  { %v139_v40 = vmax.f32 %v134_v37, 0.0  ;;  %v140_v43 = vpack.c.bf16 %v138_v38, %v138_v38 }
  0xd8   :  { %v136_v41 = vpop.f32.mrf.mxu0 }
  0xd9   :  { %v141_v42 = vpack.c.bf16 %v139_v40, %v139_v40 }
  0xdb   :  { %309 = vmatprep.mubr.bf16.mxu1 %v141_v42 }
  0xdc   :  { %310 = vmatmul.mubr.bf16.vlgmr.msra.gmra.mxu1 %v140_v43 }
 0x19c   :  { %v461_v46 = vpop.f32.mrf.mxu1 }
 0x19e   :  { %v462_v48 = vpop.f32.mrf.mxu1 }
 0x19f   :  { %v463_v49 = vadd.f32 %v462_v48, %v461_v46 }
 0x1a0   :  { %v464_v50 = vpop.f32.mrf.mxu1 }
 0x1a1   :  { %v312_v51 = vadd.f32 %v463_v49, %v424_v47 }
 0x1a2   :  { %v465_v52 = vpop.f32.mrf.mxu1 }
 0x1a3   :  { %v441_v53 = vmul.f32 -1.442695, %v312_v51 }
 0x1a5   :  { %509 = vpow2.f32 %v441_v53 }
 0x1b2   :  { %v510_v54 = vpop.eup %509 }
 0x1b3   :  { %v320_v55 = vadd.f32 1.0, %v510_v54 }
 0x1b5   :  { %511 = vrcp.f32 %v320_v55 }
 0x1c2   :  { %v512_v56 = vpop.eup %511 }
 0x1c3   :  { %v323_v57 = vpack.c.bf16 %v512_v56, %v512_v56  ;;  %384 = vst.msk [vmem:[#allocation2] sm:$0x3] %vm383_vm2, %v512_v56 }
 0x1c5   :  { %472 = vmatmul.mubr.msk.bf16.vlgmr.msra.gmra.mxu0 %vm339_vm3, %v323_v57 }
 0x1c6   :  { %524 = shalt.err (!%p521_p4)
}
 0x1c7   :  { %396 = dma.vmem_to_hbm [thread:$0]  %s394_s1, 32, %s707_s7, [#allocation3]   ;;  %v442_v58 = vld [vmem:[%s706_s6] ss:$0 sm:$0xff]  ;;  %vm385_vm4 = vcmask 58368  }
 0x1c8   :  { %s561_s16 = smov [#allocation4]  }
 0x1c9   :  { %s403_s17 = sshll.u32 %s561_s16, 4  ;;  %s404_s17 = int_to_ptr.vmem [resolvable:$true] %s403_s17 }
 0x1ca   :  { %s533_s18 = scalar_lea.vmem %s404_s17, 32  ;;  %p538_p6 = scmp.lt.s32.totalorder %s404_s17, %s404_s17 }
 0x1cb   :  { %p534_p5 = scmp.ne.s32.totalorder %s404_s17, %s533_s18  ;;  %p539_p7 = scmp.lt.s32.totalorder %s533_s18, %s533_s18 }
 0x1cd   :  { %p540_p8 = por %p539_p7, %p538_p6 }
 0x1cf   :  { %p541_p9 = pnand %p540_p8, %p534_p5 }
 0x285   :  { %v377_v59 = vpop.f32.mrf.mxu0 }
 0x286   :  { %v378_v60 = vadd.f32 %v442_v58, %v377_v59 }
 0x287   :  { %v473_v61 = vpop.f32.mrf.mxu0 }
 0x288   :  { %386 = vst.msk [vmem:[#allocation4] sm:$0x3] %vm385_vm4, %v378_v60 }
 0x289   :  { %v380_v62 = vpop.f32.mrf.mxu0 }
 0x28a   :  { %544 = shalt.err (!%p541_p9)
}
 0x28b   :  { %406 = dma.vmem_to_hbm [thread:$0]  %s404_s17, 32, %s708_s8, [#allocation5]   ;;  %v474_v63 = vpop.f32.mrf.mxu0 }
 0x28c   :  { %553 = dma.done.wait [#allocation3], 32  }
 0x28d   :  { %554 = vsyncadd [#allocation3], 4294967264 }
 0x28e   :  { %555 = dma.done.wait [#allocation5], 32  }
 0x28f   :  { %556 = vsyncadd [#allocation5], 4294967264 }
 0x290   :  { %413 = vsyncpa [#allocation3], 1 }
 0x291   :  { %414 = vsyncpa [#allocation5], 1 }

</bundles_post_ra>
